<compile_context>
chip_gen: v7x
topology: tpu7x:2x2x1
jax: 0.10.0
libtpu: 0.0.40
codegen_flags: <defaults>
</compile_context>

<pallas_src>
import functools

import jax
import jax.numpy as jnp
from jax.experimental import pallas as pl
from jax.experimental.pallas import tpu as pltpu


# ----------------------- fused kernel: proj + attn + out + LN -----------------------
def _mha_fused_kernel(q_ref, k_ref, v_ref, wq_ref, wk_ref, wv_ref,
                      w_out_ref, b_ref, g_ref, beta_ref, o_ref,
                      *, n_heads, dim_q_k, dim_v, scale, eps):
    # q_ref: (1, q_len, dim_m) f32      k_ref/v_ref: (1, seq_len, dim_m) f32
    # wq_ref/wk_ref: (dim_m, n_heads*dim_q_k) bf16   wv_ref: (dim_m, n_heads*dim_v) bf16
    # w_out_ref: (n_heads*dim_v, dim_m) bf16
    # b_ref/g_ref/beta_ref: (1, dim_m) f32           o_ref: (1, q_len, dim_m) f32
    residual = q_ref[0]                                 # (q_len, dim_m) f32
    q = residual.astype(jnp.bfloat16)
    k = k_ref[0].astype(jnp.bfloat16)
    v = v_ref[0].astype(jnp.bfloat16)

    # hoisted once-per-step broadcasts
    bias = b_ref[...]                                   # (1, dim_m) f32
    gamma = g_ref[...]
    beta = beta_ref[...]

    # fused head projections (all heads in one matmul each), bf16 in / f32 acc
    qp = jnp.dot(q, wq_ref[...], preferred_element_type=jnp.float32) * scale
    kp = jnp.dot(k, wk_ref[...], preferred_element_type=jnp.float32)
    vp = jnp.dot(v, wv_ref[...], preferred_element_type=jnp.float32)

    qp = qp.astype(jnp.bfloat16)                        # (q_len,  H*dqk)
    kp = kp.astype(jnp.bfloat16)                        # (seq_len,H*dqk)
    vp = vp.astype(jnp.bfloat16)                        # (seq_len,H*dv)

    # per-head softmax attention (small, unrolled; heads live in the lane dim)
    ctx_heads = []
    for h in range(n_heads):
        qh = qp[:, h * dim_q_k:(h + 1) * dim_q_k]       # (q_len, dqk)
        kh = kp[:, h * dim_q_k:(h + 1) * dim_q_k]       # (seq_len, dqk)
        vh = vp[:, h * dim_v:(h + 1) * dim_v]           # (seq_len, dv)
        # scores (q_len, seq_len): contract on dim 1 of both -> no explicit K transpose
        s = jax.lax.dot_general(qh, kh, (((1,), (1,)), ((), ())),
                                preferred_element_type=jnp.float32)
        s = s - jnp.max(s, axis=-1, keepdims=True)
        e = jnp.exp(s)
        inv_den = pl.reciprocal(jnp.sum(e, axis=-1, keepdims=True), approx=True)
        attn = e * inv_den                              # (q_len, seq_len) f32
        ctx_heads.append(
            jnp.dot(attn.astype(jnp.bfloat16), vh,
                    preferred_element_type=jnp.float32))  # (q_len, dv) f32
    concat = jnp.concatenate(ctx_heads, axis=-1)        # (q_len, H*dv) f32, lane-dense

    # output projection + bias + residual (f32 accumulation)
    y = jnp.dot(concat.astype(jnp.bfloat16), w_out_ref[...],
                preferred_element_type=jnp.float32)
    y = y + bias + residual

    # LayerNorm(eps) in f32
    mean = jnp.mean(y, axis=-1, keepdims=True)
    var = jnp.mean((y - mean) ** 2, axis=-1, keepdims=True)
    y_norm = (y - mean) * jax.lax.rsqrt(var + eps)
    o_ref[0] = (y_norm * gamma + beta).astype(o_ref.dtype)


# ------------------------------------- wrapper ---------------------------------------
def multi_head_attention(value, key, query, params):
    """value/key: (B, S, dim_m), query: (B, Q, dim_m) -> (B, Q, dim_m)."""
    wq, wk, wv = params["wq"], params["wk"], params["wv"]
    w_out, b_out = params["w_out"], params["b_out"]
    gamma, beta = params["gamma"], params["beta"]

    n_heads, dim_m, dim_q_k = wq.shape
    dim_v = wv.shape[-1]
    batch, seq_len, _ = key.shape
    q_len = query.shape[1]
    scale = float(dim_q_k) ** -0.5

    # fold heads into the lane dim, cast weights to bf16 once (tiny, one-time)
    wq_f = jnp.transpose(wq, (1, 0, 2)).reshape(dim_m, n_heads * dim_q_k).astype(jnp.bfloat16)
    wk_f = jnp.transpose(wk, (1, 0, 2)).reshape(dim_m, n_heads * dim_q_k).astype(jnp.bfloat16)
    wv_f = jnp.transpose(wv, (1, 0, 2)).reshape(dim_m, n_heads * dim_v).astype(jnp.bfloat16)
    w_out_bf = w_out.astype(jnp.bfloat16)

    kernel = functools.partial(
        _mha_fused_kernel,
        n_heads=n_heads, dim_q_k=dim_q_k, dim_v=dim_v, scale=scale, eps=1e-12)

    out = pl.pallas_call(
        kernel,
        out_shape=jax.ShapeDtypeStruct((batch, q_len, dim_m), jnp.float32),
        grid=(batch,),
        in_specs=[
            pl.BlockSpec((1, q_len, dim_m), lambda b: (b, 0, 0)),            # query / residual
            pl.BlockSpec((1, seq_len, dim_m), lambda b: (b, 0, 0)),          # key
            pl.BlockSpec((1, seq_len, dim_m), lambda b: (b, 0, 0)),          # value
            pl.BlockSpec((dim_m, n_heads * dim_q_k), lambda b: (0, 0)),      # wq (folded)
            pl.BlockSpec((dim_m, n_heads * dim_q_k), lambda b: (0, 0)),      # wk (folded)
            pl.BlockSpec((dim_m, n_heads * dim_v), lambda b: (0, 0)),        # wv (folded)
            pl.BlockSpec((n_heads * dim_v, dim_m), lambda b: (0, 0)),        # w_out
            pl.BlockSpec((1, dim_m), lambda b: (0, 0)),                      # b_out
            pl.BlockSpec((1, dim_m), lambda b: (0, 0)),                      # gamma
            pl.BlockSpec((1, dim_m), lambda b: (0, 0)),                      # beta
        ],
        out_specs=pl.BlockSpec((1, q_len, dim_m), lambda b: (b, 0, 0)),
        compiler_params=pltpu.CompilerParams(dimension_semantics=("parallel",)),
    )(query, key, value, wq_f, wk_f, wv_f, w_out_bf, b_out, gamma, beta)

    return out


# ------------------------------- pure-JAX f32 reference -------------------------------
def reference(value, key, query, params):
    wq, wk, wv = params["wq"], params["wk"], params["wv"]
    w_out, b_out = params["w_out"], params["b_out"]
    gamma, beta = params["gamma"], params["beta"]
    n_heads, dim_m, dim_q_k = wq.shape
    scale = float(dim_q_k) ** -0.5

    qp = jnp.einsum("bqd,hde->hbqe", query, wq)
    kp = jnp.einsum("bsd,hde->hbse", key, wk)
    vp = jnp.einsum("bsd,hdv->hbsv", value, wv)
    adj = jnp.einsum("hbqe,hbse->hbqs", qp, kp) * scale
    attn = jax.nn.softmax(adj, axis=-1)
    ctx = jnp.einsum("hbqs,hbsv->hbqv", attn, vp)
    B, Q = query.shape[0], query.shape[1]
    concat = jnp.transpose(ctx, (1, 2, 0, 3)).reshape(B, Q, -1)
    y = concat @ w_out + b_out[0] + query
    mean = jnp.mean(y, axis=-1, keepdims=True)
    var = jnp.mean((y - mean) ** 2, axis=-1, keepdims=True)
    return (y - mean) / jnp.sqrt(var + 1e-12) * gamma[0] + beta[0]


if __name__ == "__main__":
    # small, module-consistent shapes
    batch, seq_len, q_len = 2, 8, 8
    n_heads, dim_m, dim_q_k, dim_v = 4, 32, 16, 16

    root = jax.random.PRNGKey(0)
    ks = jax.random.split(root, 8)

    # deterministic, kaiming-style init (fan_in = dim_m * dim_out for 3D params)
    def kaiming(k, shape, fan_in):
        return jax.random.normal(k, shape, jnp.float32) * (2.0 / fan_in) ** 0.5

    params = {
        "wq": kaiming(ks[0], (n_heads, dim_m, dim_q_k), dim_m * dim_q_k),
        "wk": kaiming(ks[1], (n_heads, dim_m, dim_q_k), dim_m * dim_q_k),
        "wv": kaiming(ks[2], (n_heads, dim_m, dim_v), dim_m * dim_v),
        "w_out": jax.random.normal(ks[3], (n_heads * dim_v, dim_m), jnp.float32)
                 * (1.0 / (n_heads * dim_v)) ** 0.5,
        "b_out": jax.random.normal(ks[4], (1, dim_m), jnp.float32) * 0.01,
        "gamma": jnp.ones((1, dim_m), jnp.float32),
        "beta": jnp.zeros((1, dim_m), jnp.float32),
    }

    value = jax.random.normal(ks[5], (batch, seq_len, dim_m), jnp.float32)
    key_t = jax.random.normal(ks[6], (batch, seq_len, dim_m), jnp.float32)
    query = jax.random.normal(ks[7], (batch, q_len, dim_m), jnp.float32)

    out = multi_head_attention(value, key_t, query, params)
    out = jax.block_until_ready(out)

    ref = reference(value, key_t, query, params)
    assert out.shape == (batch, q_len, dim_m)
    # bf16 matmul operands (f32 accumulation) -> slightly looser tolerance vs f32 reference
    assert jnp.allclose(out, ref, atol=2e-2, rtol=2e-2), "mismatch vs reference"

    print("KERNEL_OK")
</pallas_src>

<mosaic_0001>
module attributes {stable_mosaic.version = 11 : i64} {
  func.func @_mha_fused_kernel(%arg0: i32, %arg1: memref<1x8x32xf32, #tpu.memory_space<vmem>>, %arg2: memref<1x8x32xf32, #tpu.memory_space<vmem>>, %arg3: memref<1x8x32xf32, #tpu.memory_space<vmem>>, %arg4: memref<32x64xbf16, #tpu.memory_space<vmem>>, %arg5: memref<32x64xbf16, #tpu.memory_space<vmem>>, %arg6: memref<32x64xbf16, #tpu.memory_space<vmem>>, %arg7: memref<64x32xbf16, #tpu.memory_space<vmem>>, %arg8: memref<1x32xf32, #tpu.memory_space<vmem>>, %arg9: memref<1x32xf32, #tpu.memory_space<vmem>>, %arg10: memref<1x32xf32, #tpu.memory_space<vmem>>, %arg11: memref<1x8x32xf32, #tpu.memory_space<vmem>>) attributes {dimension_semantics = [#tpu.dimension_semantics<parallel>], iteration_bounds = array<i64: 2>, scalar_prefetch = 0 : i64, scratch_operands = 0 : i64, tpu.core_type = #tpu.core_type<tc>, window_params = [{transform_indices = @transform_0, window_bounds = array<i64: 1, 8, 32>}, {transform_indices = @transform_1, window_bounds = array<i64: 1, 8, 32>}, {transform_indices = @transform_2, window_bounds = array<i64: 1, 8, 32>}, {pipeline_mode = #tpu.pipeline_mode<synchronous>, transform_indices = @transform_3, window_bounds = array<i64: 32, 64>}, {pipeline_mode = #tpu.pipeline_mode<synchronous>, transform_indices = @transform_4, window_bounds = array<i64: 32, 64>}, {pipeline_mode = #tpu.pipeline_mode<synchronous>, transform_indices = @transform_5, window_bounds = array<i64: 32, 64>}, {pipeline_mode = #tpu.pipeline_mode<synchronous>, transform_indices = @transform_6, window_bounds = array<i64: 64, 32>}, {pipeline_mode = #tpu.pipeline_mode<synchronous>, transform_indices = @transform_7, window_bounds = array<i64: 1, 32>}, {pipeline_mode = #tpu.pipeline_mode<synchronous>, transform_indices = @transform_8, window_bounds = array<i64: 1, 32>}, {pipeline_mode = #tpu.pipeline_mode<synchronous>, transform_indices = @transform_9, window_bounds = array<i64: 1, 32>}, {transform_indices = @transform_10, window_bounds = array<i64: 1, 8, 32>}]} {
    %c0 = arith.constant 0 : index
    %c0_0 = arith.constant 0 : index
    %c0_1 = arith.constant 0 : index
    %0 = vector.load %arg1[%c0, %c0_0, %c0_1] : memref<1x8x32xf32, #tpu.memory_space<vmem>>, vector<1x8x32xf32>
    %1 = vector.shape_cast %0 : vector<1x8x32xf32> to vector<8x32xf32>
    %2 = arith.truncf %1 : vector<8x32xf32> to vector<8x32xbf16>
    %c0_2 = arith.constant 0 : index
    %c0_3 = arith.constant 0 : index
    %c0_4 = arith.constant 0 : index
    %3 = vector.load %arg2[%c0_2, %c0_3, %c0_4] : memref<1x8x32xf32, #tpu.memory_space<vmem>>, vector<1x8x32xf32>
    %4 = vector.shape_cast %3 : vector<1x8x32xf32> to vector<8x32xf32>
    %5 = arith.truncf %4 : vector<8x32xf32> to vector<8x32xbf16>
    %c0_5 = arith.constant 0 : index
    %c0_6 = arith.constant 0 : index
    %c0_7 = arith.constant 0 : index
    %6 = vector.load %arg3[%c0_5, %c0_6, %c0_7] : memref<1x8x32xf32, #tpu.memory_space<vmem>>, vector<1x8x32xf32>
    %7 = vector.shape_cast %6 : vector<1x8x32xf32> to vector<8x32xf32>
    %8 = arith.truncf %7 : vector<8x32xf32> to vector<8x32xbf16>
    %c0_8 = arith.constant 0 : index
    %c0_9 = arith.constant 0 : index
    %9 = vector.load %arg8[%c0_8, %c0_9] : memref<1x32xf32, #tpu.memory_space<vmem>>, vector<1x32xf32>
    %c0_10 = arith.constant 0 : index
    %c0_11 = arith.constant 0 : index
    %10 = vector.load %arg9[%c0_10, %c0_11] : memref<1x32xf32, #tpu.memory_space<vmem>>, vector<1x32xf32>
    %c0_12 = arith.constant 0 : index
    %c0_13 = arith.constant 0 : index
    %11 = vector.load %arg10[%c0_12, %c0_13] : memref<1x32xf32, #tpu.memory_space<vmem>>, vector<1x32xf32>
    %c0_14 = arith.constant 0 : index
    %c0_15 = arith.constant 0 : index
    %12 = vector.load %arg4[%c0_14, %c0_15] : memref<32x64xbf16, #tpu.memory_space<vmem>>, vector<32x64xbf16>
    %cst = arith.constant dense<0.000000e+00> : vector<8x64xf32>
    %13 = tpu.matmul %2, %12, %cst {dimension_numbers = #tpu.dot_dimension_numbers<[1], [0], [0], [1], [0, 0, 1, 1], [], []>} : vector<8x32xbf16>, vector<32x64xbf16>, vector<8x64xf32> -> vector<8x64xf32>
    %cst_16 = arith.constant 2.500000e-01 : f32
    %14 = vector.broadcast %cst_16 : f32 to vector<8x64xf32>
    %15 = arith.mulf %13, %14 : vector<8x64xf32>
    %c0_17 = arith.constant 0 : index
    %c0_18 = arith.constant 0 : index
    %16 = vector.load %arg5[%c0_17, %c0_18] : memref<32x64xbf16, #tpu.memory_space<vmem>>, vector<32x64xbf16>
    %cst_19 = arith.constant dense<0.000000e+00> : vector<8x64xf32>
    %17 = tpu.matmul %5, %16, %cst_19 {dimension_numbers = #tpu.dot_dimension_numbers<[1], [0], [0], [1], [0, 0, 1, 1], [], []>} : vector<8x32xbf16>, vector<32x64xbf16>, vector<8x64xf32> -> vector<8x64xf32>
    %c0_20 = arith.constant 0 : index
    %c0_21 = arith.constant 0 : index
    %18 = vector.load %arg6[%c0_20, %c0_21] : memref<32x64xbf16, #tpu.memory_space<vmem>>, vector<32x64xbf16>
    %cst_22 = arith.constant dense<0.000000e+00> : vector<8x64xf32>
    %19 = tpu.matmul %8, %18, %cst_22 {dimension_numbers = #tpu.dot_dimension_numbers<[1], [0], [0], [1], [0, 0, 1, 1], [], []>} : vector<8x32xbf16>, vector<32x64xbf16>, vector<8x64xf32> -> vector<8x64xf32>
    %20 = arith.truncf %15 : vector<8x64xf32> to vector<8x64xbf16>
    %21 = arith.truncf %17 : vector<8x64xf32> to vector<8x64xbf16>
    %22 = arith.truncf %19 : vector<8x64xf32> to vector<8x64xbf16>
    %23 = vector.extract_strided_slice %20 {offsets = [0, 0], sizes = [8, 16], strides = [1, 1]} : vector<8x64xbf16> to vector<8x16xbf16>
    %24 = vector.extract_strided_slice %21 {offsets = [0, 0], sizes = [8, 16], strides = [1, 1]} : vector<8x64xbf16> to vector<8x16xbf16>
    %25 = vector.extract_strided_slice %22 {offsets = [0, 0], sizes = [8, 16], strides = [1, 1]} : vector<8x64xbf16> to vector<8x16xbf16>
    %cst_23 = arith.constant dense<0.000000e+00> : vector<8x8xf32>
    %26 = tpu.matmul %23, %24, %cst_23 {dimension_numbers = #tpu.dot_dimension_numbers<[1], [1], [0], [0], [0, 0, 1, 0], [], []>} : vector<8x16xbf16>, vector<8x16xbf16>, vector<8x8xf32> -> vector<8x8xf32>
    %cst_24 = arith.constant dense<0xFF800000> : vector<8xf32>
    %27 = vector.multi_reduction <maximumf>, %26, %cst_24 [1] : vector<8x8xf32> to vector<8xf32>
    %28 = vector.shape_cast %27 : vector<8xf32> to vector<8x1xf32>
    %29 = vector.broadcast %28 : vector<8x1xf32> to vector<8x8xf32>
    %30 = arith.subf %26, %29 : vector<8x8xf32>
    %31 = math.exp %30 : vector<8x8xf32>
    %cst_25 = arith.constant dense<0.000000e+00> : vector<8xf32>
    %32 = vector.multi_reduction <add>, %31, %cst_25 [1] : vector<8x8xf32> to vector<8xf32>
    %33 = vector.shape_cast %32 : vector<8xf32> to vector<8x1xf32>
    %34 = tpu.reciprocal %33 {approx = true} : vector<8x1xf32> -> vector<8x1xf32>
    %35 = vector.broadcast %34 : vector<8x1xf32> to vector<8x8xf32>
    %36 = arith.mulf %31, %35 : vector<8x8xf32>
    %37 = arith.truncf %36 : vector<8x8xf32> to vector<8x8xbf16>
    %cst_26 = arith.constant dense<0.000000e+00> : vector<8x16xf32>
    %38 = tpu.matmul %37, %25, %cst_26 {dimension_numbers = #tpu.dot_dimension_numbers<[1], [0], [0], [1], [0, 0, 1, 1], [], []>} : vector<8x8xbf16>, vector<8x16xbf16>, vector<8x16xf32> -> vector<8x16xf32>
    %39 = vector.extract_strided_slice %20 {offsets = [0, 16], sizes = [8, 16], strides = [1, 1]} : vector<8x64xbf16> to vector<8x16xbf16>
    %40 = vector.extract_strided_slice %21 {offsets = [0, 16], sizes = [8, 16], strides = [1, 1]} : vector<8x64xbf16> to vector<8x16xbf16>
    %41 = vector.extract_strided_slice %22 {offsets = [0, 16], sizes = [8, 16], strides = [1, 1]} : vector<8x64xbf16> to vector<8x16xbf16>
    %cst_27 = arith.constant dense<0.000000e+00> : vector<8x8xf32>
    %42 = tpu.matmul %39, %40, %cst_27 {dimension_numbers = #tpu.dot_dimension_numbers<[1], [1], [0], [0], [0, 0, 1, 0], [], []>} : vector<8x16xbf16>, vector<8x16xbf16>, vector<8x8xf32> -> vector<8x8xf32>
    %cst_28 = arith.constant dense<0xFF800000> : vector<8xf32>
    %43 = vector.multi_reduction <maximumf>, %42, %cst_28 [1] : vector<8x8xf32> to vector<8xf32>
    %44 = vector.shape_cast %43 : vector<8xf32> to vector<8x1xf32>
    %45 = vector.broadcast %44 : vector<8x1xf32> to vector<8x8xf32>
    %46 = arith.subf %42, %45 : vector<8x8xf32>
    %47 = math.exp %46 : vector<8x8xf32>
    %cst_29 = arith.constant dense<0.000000e+00> : vector<8xf32>
    %48 = vector.multi_reduction <add>, %47, %cst_29 [1] : vector<8x8xf32> to vector<8xf32>
    %49 = vector.shape_cast %48 : vector<8xf32> to vector<8x1xf32>
    %50 = tpu.reciprocal %49 {approx = true} : vector<8x1xf32> -> vector<8x1xf32>
    %51 = vector.broadcast %50 : vector<8x1xf32> to vector<8x8xf32>
    %52 = arith.mulf %47, %51 : vector<8x8xf32>
    %53 = arith.truncf %52 : vector<8x8xf32> to vector<8x8xbf16>
    %cst_30 = arith.constant dense<0.000000e+00> : vector<8x16xf32>
    %54 = tpu.matmul %53, %41, %cst_30 {dimension_numbers = #tpu.dot_dimension_numbers<[1], [0], [0], [1], [0, 0, 1, 1], [], []>} : vector<8x8xbf16>, vector<8x16xbf16>, vector<8x16xf32> -> vector<8x16xf32>
    %55 = vector.extract_strided_slice %20 {offsets = [0, 32], sizes = [8, 16], strides = [1, 1]} : vector<8x64xbf16> to vector<8x16xbf16>
    %56 = vector.extract_strided_slice %21 {offsets = [0, 32], sizes = [8, 16], strides = [1, 1]} : vector<8x64xbf16> to vector<8x16xbf16>
    %57 = vector.extract_strided_slice %22 {offsets = [0, 32], sizes = [8, 16], strides = [1, 1]} : vector<8x64xbf16> to vector<8x16xbf16>
    %cst_31 = arith.constant dense<0.000000e+00> : vector<8x8xf32>
    %58 = tpu.matmul %55, %56, %cst_31 {dimension_numbers = #tpu.dot_dimension_numbers<[1], [1], [0], [0], [0, 0, 1, 0], [], []>} : vector<8x16xbf16>, vector<8x16xbf16>, vector<8x8xf32> -> vector<8x8xf32>
    %cst_32 = arith.constant dense<0xFF800000> : vector<8xf32>
    %59 = vector.multi_reduction <maximumf>, %58, %cst_32 [1] : vector<8x8xf32> to vector<8xf32>
    %60 = vector.shape_cast %59 : vector<8xf32> to vector<8x1xf32>
    %61 = vector.broadcast %60 : vector<8x1xf32> to vector<8x8xf32>
    %62 = arith.subf %58, %61 : vector<8x8xf32>
    %63 = math.exp %62 : vector<8x8xf32>
    %cst_33 = arith.constant dense<0.000000e+00> : vector<8xf32>
    %64 = vector.multi_reduction <add>, %63, %cst_33 [1] : vector<8x8xf32> to vector<8xf32>
    %65 = vector.shape_cast %64 : vector<8xf32> to vector<8x1xf32>
    %66 = tpu.reciprocal %65 {approx = true} : vector<8x1xf32> -> vector<8x1xf32>
    %67 = vector.broadcast %66 : vector<8x1xf32> to vector<8x8xf32>
    %68 = arith.mulf %63, %67 : vector<8x8xf32>
    %69 = arith.truncf %68 : vector<8x8xf32> to vector<8x8xbf16>
    %cst_34 = arith.constant dense<0.000000e+00> : vector<8x16xf32>
    %70 = tpu.matmul %69, %57, %cst_34 {dimension_numbers = #tpu.dot_dimension_numbers<[1], [0], [0], [1], [0, 0, 1, 1], [], []>} : vector<8x8xbf16>, vector<8x16xbf16>, vector<8x16xf32> -> vector<8x16xf32>
    %71 = vector.extract_strided_slice %20 {offsets = [0, 48], sizes = [8, 16], strides = [1, 1]} : vector<8x64xbf16> to vector<8x16xbf16>
    %72 = vector.extract_strided_slice %21 {offsets = [0, 48], sizes = [8, 16], strides = [1, 1]} : vector<8x64xbf16> to vector<8x16xbf16>
    %73 = vector.extract_strided_slice %22 {offsets = [0, 48], sizes = [8, 16], strides = [1, 1]} : vector<8x64xbf16> to vector<8x16xbf16>
    %cst_35 = arith.constant dense<0.000000e+00> : vector<8x8xf32>
    %74 = tpu.matmul %71, %72, %cst_35 {dimension_numbers = #tpu.dot_dimension_numbers<[1], [1], [0], [0], [0, 0, 1, 0], [], []>} : vector<8x16xbf16>, vector<8x16xbf16>, vector<8x8xf32> -> vector<8x8xf32>
    %cst_36 = arith.constant dense<0xFF800000> : vector<8xf32>
    %75 = vector.multi_reduction <maximumf>, %74, %cst_36 [1] : vector<8x8xf32> to vector<8xf32>
    %76 = vector.shape_cast %75 : vector<8xf32> to vector<8x1xf32>
    %77 = vector.broadcast %76 : vector<8x1xf32> to vector<8x8xf32>
    %78 = arith.subf %74, %77 : vector<8x8xf32>
    %79 = math.exp %78 : vector<8x8xf32>
    %cst_37 = arith.constant dense<0.000000e+00> : vector<8xf32>
    %80 = vector.multi_reduction <add>, %79, %cst_37 [1] : vector<8x8xf32> to vector<8xf32>
    %81 = vector.shape_cast %80 : vector<8xf32> to vector<8x1xf32>
    %82 = tpu.reciprocal %81 {approx = true} : vector<8x1xf32> -> vector<8x1xf32>
    %83 = vector.broadcast %82 : vector<8x1xf32> to vector<8x8xf32>
    %84 = arith.mulf %79, %83 : vector<8x8xf32>
    %85 = arith.truncf %84 : vector<8x8xf32> to vector<8x8xbf16>
    %cst_38 = arith.constant dense<0.000000e+00> : vector<8x16xf32>
    %86 = tpu.matmul %85, %73, %cst_38 {dimension_numbers = #tpu.dot_dimension_numbers<[1], [0], [0], [1], [0, 0, 1, 1], [], []>} : vector<8x8xbf16>, vector<8x16xbf16>, vector<8x16xf32> -> vector<8x16xf32>
    %87 = tpu.concatenate %38, %54, %70, %86 in 1 : vector<8x16xf32>, vector<8x16xf32>, vector<8x16xf32>, vector<8x16xf32> -> vector<8x64xf32>
    %88 = arith.truncf %87 : vector<8x64xf32> to vector<8x64xbf16>
    %c0_39 = arith.constant 0 : index
    %c0_40 = arith.constant 0 : index
    %89 = vector.load %arg7[%c0_39, %c0_40] : memref<64x32xbf16, #tpu.memory_space<vmem>>, vector<64x32xbf16>
    %cst_41 = arith.constant dense<0.000000e+00> : vector<8x32xf32>
    %90 = tpu.matmul %88, %89, %cst_41 {dimension_numbers = #tpu.dot_dimension_numbers<[1], [0], [0], [1], [0, 0, 1, 1], [], []>} : vector<8x64xbf16>, vector<64x32xbf16>, vector<8x32xf32> -> vector<8x32xf32>
    %91 = vector.broadcast %9 : vector<1x32xf32> to vector<8x32xf32>
    %92 = arith.addf %90, %91 : vector<8x32xf32>
    %93 = arith.addf %92, %1 : vector<8x32xf32>
    %cst_42 = arith.constant dense<0.000000e+00> : vector<8xf32>
    %94 = vector.multi_reduction <add>, %93, %cst_42 [1] : vector<8x32xf32> to vector<8xf32>
    %95 = vector.shape_cast %94 : vector<8xf32> to vector<8x1xf32>
    %cst_43 = arith.constant 3.200000e+01 : f32
    %96 = vector.broadcast %cst_43 : f32 to vector<8x1xf32>
    %97 = arith.divf %95, %96 : vector<8x1xf32>
    %98 = vector.broadcast %97 : vector<8x1xf32> to vector<8x32xf32>
    %99 = arith.subf %93, %98 : vector<8x32xf32>
    %100 = arith.mulf %99, %99 : vector<8x32xf32>
    %cst_44 = arith.constant dense<0.000000e+00> : vector<8xf32>
    %101 = vector.multi_reduction <add>, %100, %cst_44 [1] : vector<8x32xf32> to vector<8xf32>
    %102 = vector.shape_cast %101 : vector<8xf32> to vector<8x1xf32>
    %cst_45 = arith.constant 3.200000e+01 : f32
    %103 = vector.broadcast %cst_45 : f32 to vector<8x1xf32>
    %104 = arith.divf %102, %103 : vector<8x1xf32>
    %105 = vector.broadcast %97 : vector<8x1xf32> to vector<8x32xf32>
    %106 = arith.subf %93, %105 : vector<8x32xf32>
    %cst_46 = arith.constant 9.99999996E-13 : f32
    %107 = vector.broadcast %cst_46 : f32 to vector<8x1xf32>
    %108 = arith.addf %104, %107 : vector<8x1xf32>
    %109 = math.rsqrt %108 : vector<8x1xf32>
    %110 = vector.broadcast %109 : vector<8x1xf32> to vector<8x32xf32>
    %111 = arith.mulf %106, %110 : vector<8x32xf32>
    %112 = vector.broadcast %10 : vector<1x32xf32> to vector<8x32xf32>
    %113 = arith.mulf %111, %112 : vector<8x32xf32>
    %114 = vector.broadcast %11 : vector<1x32xf32> to vector<8x32xf32>
    %115 = arith.addf %113, %114 : vector<8x32xf32>
    %c0_47 = arith.constant 0 : index
    %c0_48 = arith.constant 0 : index
    %c0_49 = arith.constant 0 : index
    %116 = vector.load %arg11[%c0_47, %c0_48, %c0_49] : memref<1x8x32xf32, #tpu.memory_space<vmem>>, vector<1x8x32xf32>
    %117 = vector.shape_cast %116 : vector<1x8x32xf32> to vector<8x32xf32>
    %118 = vector.shape_cast %115 : vector<8x32xf32> to vector<1x8x32xf32>
    tpu.vector_store %arg11[%c0_47, %c0_48, %c0_49], %118 {strides = array<i32>} : memref<1x8x32xf32, #tpu.memory_space<vmem>>, vector<1x8x32xf32>,
    return
  }
  func.func @transform_0(%arg0: i32) -> (i32, i32, i32) {
    %c0_i32 = arith.constant 0 : i32
    %c0_i32_0 = arith.constant 0 : i32
    %c0_i32_1 = arith.constant 0 : i32
    return %arg0, %c0_i32, %c0_i32_0 : i32, i32, i32
  }
  func.func @transform_1(%arg0: i32) -> (i32, i32, i32) {
    %c0_i32 = arith.constant 0 : i32
    %c0_i32_0 = arith.constant 0 : i32
    %c0_i32_1 = arith.constant 0 : i32
    return %arg0, %c0_i32, %c0_i32_0 : i32, i32, i32
  }
  func.func @transform_2(%arg0: i32) -> (i32, i32, i32) {
    %c0_i32 = arith.constant 0 : i32
    %c0_i32_0 = arith.constant 0 : i32
    %c0_i32_1 = arith.constant 0 : i32
    return %arg0, %c0_i32, %c0_i32_0 : i32, i32, i32
  }
  func.func @transform_3(%arg0: i32) -> (i32, i32) {
    %c0_i32 = arith.constant 0 : i32
    %c0_i32_0 = arith.constant 0 : i32
    %c0_i32_1 = arith.constant 0 : i32
    return %c0_i32, %c0_i32_0 : i32, i32
  }
  func.func @transform_4(%arg0: i32) -> (i32, i32) {
    %c0_i32 = arith.constant 0 : i32
    %c0_i32_0 = arith.constant 0 : i32
    %c0_i32_1 = arith.constant 0 : i32
    return %c0_i32, %c0_i32_0 : i32, i32
  }
  func.func @transform_5(%arg0: i32) -> (i32, i32) {
    %c0_i32 = arith.constant 0 : i32
    %c0_i32_0 = arith.constant 0 : i32
    %c0_i32_1 = arith.constant 0 : i32
    return %c0_i32, %c0_i32_0 : i32, i32
  }
  func.func @transform_6(%arg0: i32) -> (i32, i32) {
    %c0_i32 = arith.constant 0 : i32
    %c0_i32_0 = arith.constant 0 : i32
    %c0_i32_1 = arith.constant 0 : i32
    return %c0_i32, %c0_i32_0 : i32, i32
  }
  func.func @transform_7(%arg0: i32) -> (i32, i32) {
    %c0_i32 = arith.constant 0 : i32
    %c0_i32_0 = arith.constant 0 : i32
    %c0_i32_1 = arith.constant 0 : i32
    return %c0_i32, %c0_i32_0 : i32, i32
  }
  func.func @transform_8(%arg0: i32) -> (i32, i32) {
    %c0_i32 = arith.constant 0 : i32
    %c0_i32_0 = arith.constant 0 : i32
    %c0_i32_1 = arith.constant 0 : i32
    return %c0_i32, %c0_i32_0 : i32, i32
  }
  func.func @transform_9(%arg0: i32) -> (i32, i32) {
    %c0_i32 = arith.constant 0 : i32
    %c0_i32_0 = arith.constant 0 : i32
    %c0_i32_1 = arith.constant 0 : i32
    return %c0_i32, %c0_i32_0 : i32, i32
  }
  func.func @transform_10(%arg0: i32) -> (i32, i32, i32) {
    %c0_i32 = arith.constant 0 : i32
    %c0_i32_0 = arith.constant 0 : i32
    %c0_i32_1 = arith.constant 0 : i32
    return %arg0, %c0_i32, %c0_i32_0 : i32, i32, i32
  }
}

</mosaic_0001>

<bundles_post_ra>
// kernel: tpu_custom_call.1
= control target key start
LH: loop header
LB: loop body
LE: loop exit
PB: predicated region body
PF: predicated region fallthrough
CT: control target
= control target key end

     0   :  { %15 = vsyncpa [#allocation3], 0  ;;  %s2141_s0 = inlined_call_operand.vmem [shape: f32[2,8,32], index: 0, kind: input, shape index: {}]   ;;  %s2142_s1 = inlined_call_operand.vmem [shape: f32[2,8,32], index: 1, kind: input, shape index: {}]   ;;  %s2143_s2 = inlined_call_operand.vmem [shape: f32[2,8,32], index: 2, kind: input, shape index: {}]   ;;  %s2144_s3 = inlined_call_operand.hbm [shape: bf16[32,64], index: 3, kind: input, shape index: {}]   ;;  %s2145_s4 = inlined_call_operand.hbm [shape: bf16[32,64], index: 4, kind: input, shape index: {}]   ;;  %s2146_s5 = inlined_call_operand.hbm [shape: bf16[32,64], index: 5, kind: input, shape index: {}]   ;;  %s2147_s6 = inlined_call_operand.vmem [shape: bf16[64,32], index: 6, kind: input, shape index: {}]   ;;  %s2148_s7 = inlined_call_operand.vmem [shape: f32[1,32], index: 7, kind: input, shape index: {}]   ;;  %s2149_s8 = inlined_call_operand.vmem [shape: f32[1,32], index: 8, kind: input, shape index: {}]   ;;  %s2150_s9 = inlined_call_operand.vmem [shape: f32[1,32], index: 9, kind: input, shape index: {}]   ;;  %s2151_s10 = inlined_call_operand.hbm [shape: f32[2,8,32], index: 10, kind: output, shape index: {}]  }
   0x1   :  { %16 = vsyncpa [#allocation6], 0 }
   0x2   :  { %17 = vsyncpa [#allocation4], 0 }
   0x3   :  { %19 = vsyncpa [#allocation4 + $0x1], 0  ;;  %s1812_s13 = smov 0   ;;  %s1814_s14 = smov 0  }
   0x4   :  { %s1816_s15 = smov 0   ;;  %s1818_s16 = smov 0  }
   0x5 LB: > { %2161 = sst [smem:[#allocation12_spill]] %s1729_s13  ;;  %s1833_s17 = sadd.s32 4294967295, %s1741_s16   ;;  %s1741_s16 = sphi %s1818_s16, %s2182_s16   ;;  %s1737_s15 = sphi %s1816_s15, %s2184_s15   ;;  %s1733_s14 = sphi %s1814_s14, %s2186_s14   ;;  %s1729_s13 = sphi %s1812_s13, %s2185_s13  }
   0x6   : > { %2162 = sst [smem:[#allocation13_spill]] %s1737_s15  ;;  %s1322_s18 = sadd.s32 4294967294, %s1741_s16  }
   0x7   : > { %2163 = sst [smem:[#allocation14_spill]] %s1741_s16  ;;  %s1837_s19 = sadd.s32 1, %s1741_s16  }
   0x8   : > { %2164 = sst [smem:[#allocation15_spill]] %s1837_s19  ;;  %s257_s20 = sadd.s32 1, %s1737_s15 }
   0x9   : > { %s254_s21 = ssub.s32 %s1741_s16, %s1837_s19  ;;  %p267_p0 = scmp.ne.s32.totalorder %s1737_s15, %s1733_s14 }
   0xa   : > { %p255_p1 = scmp.eq.s32.totalorder %s254_s21, 0  ;;  %p268_p2 = scmp.eq.s32.totalorder %s1833_s17, 1 }
   0xb   : > { %p273_p3 = scmp.ne.s32.totalorder %s1733_s14, %s1729_s13  ;;  %p274_p4 = scmp.eq.s32.totalorder %s1322_s18, 1 }
   0xc   : > { %s1848_s22 = scalar_select %p255_p1, %s1737_s15, %s257_s20  }
   0xd   : > { %p1850_p5 = por %p268_p2, %p267_p0  ;;  %p1854_p6 = por %p274_p4, %p273_p3 }
   0xe   : > { %2165 = sst [smem:[#allocation16_spill]] %s1848_s22  ;;  %p1323_p7 = scmp.ge.s32.totalorder %s1741_s16, 1 }
   0xf   : > { %s2166_s23 = scalar_select %p1850_p5, 1, 0 }
  0x10   : > { %s2167_s24 = scalar_select %p1854_p6, 1, 0 }
  0x11   : > { %p281_p8 = scmp.lt.s32.totalorder %s1741_s16, 3  ;;  %p2153_p9 = scmp.eq.s32.totalorder %s1833_s17, 0 }
  0x12   : > { %2168 = sst [smem:[#allocation17_spill]] %s2167_s24  ;;  %s1743_s26 = smov [#allocation5]  }
  0x13   : > { %p1861_p10 = pnand %p1323_p7, %p281_p8  ;;  %s306_s27 = sshll.u32 %s1743_s26, 4  ;;  %s1867_s27 = int_to_ptr.vmem [resolvable:$true] %s306_s27 }
  0x14   : > { %s1744_s29 = smov [#allocation2]   ;;  %s1745_s11 = smov [#allocation7]  }
  0x15   : > { %s2169_s25 = scalar_select %p1861_p10, 1, 0 }
  0x16   : > { %p1493_p11 = pneg %p1861_p10  ;;  %s293_s30 = sshll.u32 %s1744_s29, 4  ;;  %s1875_s30 = int_to_ptr.vmem [resolvable:$true] %s293_s30 }
  0x17   : > { %s1877_s12 = sshll.u32 %s1745_s11, 4  ;;  %s1587_s21 = scalar_lea.hbm %s2145_s4, 256  ;;  %s320_s12 = int_to_ptr.vmem [resolvable:$true] %s1877_s12 }
  0x18   : > { %p1871_p12 = pnand %p2153_p9, %p1493_p11  ;;  %p1588_p13 = scmp.ne.s32.totalorder %s2145_s4, %s1587_s21 }
  0x19   : > { %p1594_p3 = scmp.lt.u32.totalorder %s1587_s21, %s2145_s4 }
  0x1a   : > { %p1887_p0 = pneg %p1871_p12 }
  0x1c   : > { %p1590_p1 = pnand %p1887_p0, %p1588_p13 }
  0x1e   : > { %p1591_p2 = pneg %p1590_p1 }
  0x20   : > { %p1596_p4 = pnand %p1594_p3, %p1591_p2 }
  0x22   : > { %1599 = shalt.err (!%p1596_p4)
}
  0x23   : > { %s1600_s22 = scalar_lea.vmem %s1867_s27, 256  ;;  %p1608_p9 = scmp.lt.s32.totalorder %s1867_s27, %s1867_s27 }
  0x24   : > { %p1601_p7 = scmp.ne.s32.totalorder %s1867_s27, %s1600_s22  ;;  %p1609_p6 = scmp.lt.s32.totalorder %s1600_s22, %s1600_s22 }
  0x26   : > { %p1603_p8 = pnand %p1601_p7, %p1887_p0  ;;  %p1610_p13 = por %p1609_p6, %p1608_p9 }
  0x28   : > { %p1604_p11 = pneg %p1603_p8 }
  0x2a   : > { %p1611_p1 = pnand %p1610_p13, %p1604_p11 }
  0x2c   : > { %1614 = shalt.err (!%p1611_p1)
}
  0x2d   : > { %s1746_s18 = smov 64   ;;  %s1747_s20 = smov 4  }
  0x2e   : > { %1499 = dma.hbm_to_vmem [thread:$0]  (!%p1871_p12), %s2145_s4, 256, %s1867_s27, [#allocation6], %s1746_s18, %s1746_s18, %s1747_s20  }
  0x2f   : > { %s1615_s22 = scalar_lea.hbm %s2144_s3, 256 }
  0x30   : > { %p1616_p6 = scmp.ne.s32.totalorder %s2144_s3, %s1615_s22  ;;  %p1622_p3 = scmp.lt.u32.totalorder %s1615_s22, %s2144_s3 }
  0x32   : > { %p1618_p9 = pnand %p1616_p6, %p1887_p0 }
  0x34   : > { %p1619_p2 = pneg %p1618_p9 }
  0x36   : > { %p1624_p4 = pnand %p1622_p3, %p1619_p2 }
  0x38   : > { %1627 = shalt.err (!%p1624_p4)
}
  0x39   : > { %s1628_s27 = scalar_lea.vmem %s1875_s30, 256  ;;  %p1636_p13 = scmp.lt.s32.totalorder %s1875_s30, %s1875_s30 }
  0x3a   : > { %p1629_p7 = scmp.ne.s32.totalorder %s1875_s30, %s1628_s27  ;;  %p1637_p1 = scmp.lt.s32.totalorder %s1628_s27, %s1628_s27 }
  0x3c   : > { %p1631_p8 = pnand %p1629_p7, %p1887_p0  ;;  %p1638_p6 = por %p1637_p1, %p1636_p13 }
  0x3e   : > { %p1632_p11 = pneg %p1631_p8 }
  0x40   : > { %p1639_p9 = pnand %p1638_p6, %p1632_p11 }
  0x42   : > { %1642 = shalt.err (!%p1639_p9)
}
  0x43   : > { %1496 = dma.hbm_to_vmem [thread:$0]  (!%p1871_p12), %s2144_s3, 256, %s1875_s30, [#allocation3], %s1746_s18, %s1746_s18, %s1747_s20  }
  0x44   : > { %s1643_s21 = scalar_lea.hbm %s2146_s5, 256 }
  0x45   : > { %p1644_p2 = scmp.ne.s32.totalorder %s2146_s5, %s1643_s21  ;;  %p1650_p7 = scmp.lt.u32.totalorder %s1643_s21, %s2146_s5 }
  0x47   : > { %p1646_p3 = pnand %p1644_p2, %p1887_p0 }
  0x49   : > { %p1647_p4 = pneg %p1646_p3 }
  0x4b   : > { %p1652_p8 = pnand %p1650_p7, %p1647_p4 }
  0x4d   : > { %1655 = shalt.err (!%p1652_p8)
}
  0x4e   : > { %s1656_s27 = scalar_lea.vmem %s320_s12, 256  ;;  %p1664_p6 = scmp.lt.s32.totalorder %s320_s12, %s320_s12 }
  0x4f   : > { %p1657_p11 = scmp.ne.s32.totalorder %s320_s12, %s1656_s27  ;;  %p1665_p9 = scmp.lt.s32.totalorder %s1656_s27, %s1656_s27 }
  0x51   : > { %p1659_p13 = pnand %p1657_p11, %p1887_p0  ;;  %p1666_p5 = por %p1665_p9, %p1664_p6 }
  0x53   : > { %p1660_p1 = pneg %p1659_p13 }
  0x55   : > { %p1667_p10 = pnand %p1666_p5, %p1660_p1 }
  0x57   : > { %1670 = shalt.err (!%p1667_p10)
}
  0x58   : > { %1502 = dma.hbm_to_vmem [thread:$0]  (!%p1871_p12), %s2146_s5, 256, %s320_s12, [#allocation6], %s1746_s18, %s1746_s18, %s1747_s20  }
  0x59   : > { %p2172_p2 = scmp.ne.s32.totalorder %s2169_s25, 0 }
  0x5a   : > { %p2173_p0 = scmp.eq.s32.totalorder (!%p2172_p2), %s1833_s17, 0 }
  0x5b   : > { %368 = sbr.rel (%p2172_p2) target bundleno = 1867 (0x74b), region = 60 }
  0x62   : > { %1716 = dma.done.wait (%p2173_p0), [#allocation3], 256   ;;  %p2174_p3 = pmov %p2173_p0 }
  0x63   : > { %p2175_p5 = pmov %p2173_p0 }
  0x64   : > { %1718 = vsyncadd (%p2174_p3), [#allocation3], 4294967040 }
  0x65   : > { %1720 = dma.done.wait (%p2175_p5), [#allocation6], 512   ;;  %p2176_p10 = pmov %p2173_p0 }
  0x66   : > { %p421_p4 = scmp.lt.s32.totalorder %s1833_s17, 1  ;;  %v1748_v0 = vmov 0.0   ;;  %vm1749_vm0 = vmmov 0   ;;  %v1559_v1 = vld [vmem:[#allocation5] sm:$0xff]   ;;  %v1560_v2 = vld [vmem:[#allocation2] sm:$0xff]   ;;  %v1561_v3 = vld [vmem:[#allocation5 + $0x8] sm:$0xff]  }
  0x67   : > { %1722 = vsyncadd (%p2176_p10), [#allocation6], 4294966784  ;;  %1403 = vmatprep.subr.bf16.mxu1 %v1748_v0  ;;  %1395 = vmatprep.subr.bf16.mxu0 %v1748_v0  ;;  %v1562_v4 = vld [vmem:[#allocation2 + $0x8] sm:$0xff]   ;;  %vm459_vm1 = vcmask 261120   ;;  %vm625_vm2 = vcmask 130048   ;;  %s1750_s24 = smov 96  }
  0x68   : > { %1407 = vmatprep.mubr.msk.bf16.mxu1 %vm1749_vm0, %v1748_v0  ;;  %s422_s15 = scalar_select %p421_p4, %s1833_s17, 1  ;;  %1399 = vmatprep.mubr.msk.bf16.mxu0 %vm1749_vm0, %v1748_v0  ;;  %v1563_v21 = vld [vmem:[#allocation7] sm:$0xff]   ;;  %v1564_v22 = vld [vmem:[#allocation7 + $0x8] sm:$0xff]   ;;  %vm672_vm3 = vcmask 64512   ;;  %vm688_vm4 = vcmask 1043456   ;;  %vm1079_vm5 = vcmask 392192  }
  0x69   : > { %1404 = vmatpush3.bf16.msra.mxu1 %v1559_v1  ;;  %1396 = vmatpush3.bf16.msra.mxu0 %v1560_v2  ;;  %s1751_s21 = smov 112   ;;  %s1752_s26 = smov 80   ;;  %vm1120_vm6 = vcmask 523264  }
  0x6a   : > { %s1977_s25 = sshll.u32 %s422_s15, 3  ;;  %1405 = vmatprep.subr.bf16.mxu1 %v1748_v0  ;;  %1397 = vmatprep.subr.bf16.mxu0 %v1748_v0  ;;  %s1753_s12 = smov 16  }
  0x6b   : > { %s428_s18 = scalar_lea.vmem %s2142_s1, %s1977_s25  ;;  %s424_s19 = scalar_lea.vmem %s2141_s0, %s1977_s25 }
  0x6c   : > { %v436_v5 = vld [vmem:[%s428_s18] sm:$0xff]  ;;  %s432_s22 = scalar_lea.vmem %s2143_s2, %s1977_s25  ;;  %s1754_s16 = smov 32  }
  0x6d   : > { %v1989_v6 = vld [vmem:[%s424_s19] sm:$0xff]  ;;  %v437_v7 = vpack.c.bf16 %v436_v5, %v436_v5  ;;  %1406 = vmatpush3.bf16.msra.mxu1 %v1561_v3  ;;  %1398 = vmatpush3.bf16.msra.mxu0 %v1562_v4  ;;  %s1755_s19 = smov 48   ;;  %s1362_s13 = sshll.u32 %s1833_s17, 7 }
  0x6e   : > { %v435_v8 = vpack.c.bf16 %v1989_v6, %v1989_v6  ;;  %1419 = vmatprep.subr.bf16.mxu1 %v1748_v0  ;;  %1411 = vmatprep.subr.bf16.mxu0 %v1748_v0  ;;  %v438_v23 = vld [vmem:[%s432_s22] sm:$0xff]  ;;  %s2098_s18 = scalar_lea.hbm %s2151_s10, %s1362_s13  ;;  %p2177_p7 = scmp.ne.s32.totalorder %s2166_s23, 0 }
  0x6f   : > { %v439_v24 = vpack.c.bf16 %v438_v23, %v438_v23  ;;  %s1756_s17 = smov [#allocation8]  }
  0x70   : > { %1408 = vmatmul.mubr.msk.bf16.vlgmr.msra.gmra.mrb[0].mxu1 %vm459_vm1, %v437_v7  ;;  %1400 = vmatmul.mubr.msk.bf16.vlgmr.msra.gmra.mrb[0].mxu0 %vm459_vm1, %v435_v8 }
  0x71   : > { %1421 = vmatprep.mubr.msk.bf16.mxu1 %vm1749_vm0, %v1748_v0  ;;  %1415 = vmatprep.mubr.msk.bf16.mxu0 %vm1749_vm0, %v1748_v0 }
  0x72   : > { %1412 = vmatpush3.bf16.msra.mxu0 %v1563_v21 }
  0x73   : > { %1413 = vmatprep.subr.bf16.mxu0 %v1748_v0 }
  0x76   : > { %1414 = vmatpush3.bf16.msra.mxu0 %v1564_v22 }
  0x77   : > { %1425 = vmatprep.subr.bf16.mxu0 %v1748_v0 }
  0x79   : > { %1416 = vmatmul.mubr.msk.bf16.vlgmr.msra.gmra.mrb[4].mxu0 %vm459_vm1, %v439_v24 }
  0x7a   : > { %1427 = vmatprep.mubr.msk.bf16.mxu0 %vm1749_vm0, %v1748_v0 }
 0x143   : > { %v557_v9 = vpop.f32.mrb[0].mxu1  ;;  %v497_v12 = vpop.f32.mrb[0].mxu0 }
 0x144   : > { %v623_v10 = vpack.c.bf16 %v557_v9, %v557_v9  ;;  %v1409_v11 = vpop.f32.mrb[1].mxu1  ;;  %v503_v13 = vmul.f32 0.25, %v497_v12  ;;  %v1401_v15 = vpop.f32.mrb[1].mxu0 }
 0x145   : > { %v560_v14 = vpop.f32.mrb[2].mxu1  ;;  %v500_v18 = vpop.f32.mrb[2].mxu0 }
 0x146   : > { %847 = vrot.lane.b32.xlu1 %v623_v10, %s1750_s24  ;;  %736 = vrot.lane.b32.xlu0 %v623_v10, %s1751_s21  ;;  %v1410_v16 = vpop.f32.mrb[3].mxu1  ;;  %v630_v17 = vsel %vm625_vm2, %v623_v10, 0  ;;  %v622_v19 = vpack.c.bf16 %v503_v13, %v503_v13  ;;  %v1402_v20 = vpop.f32.mrb[3].mxu0 }
 0x147   : > { %1420 = vmatpush3.bf16.xpose.msra.mxu1 %v630_v17 }
 0x148   : > { %1431 = vmatprep.subr.bf16.mxu1 %v1748_v0 }
 0x14a   : > { %845 = vrot.lane.b32.xlu1 %v622_v19, %s1750_s24  ;;  %733 = vrot.lane.b32.xlu0 %v622_v19, %s1751_s21 }
 0x14c   : > { %v616_v39 = vpop.f32.mrb[4].mxu0 }
 0x14d   : > { %v624_v40 = vpack.c.bf16 %v616_v39, %v616_v39  ;;  %v1417_v41 = vpop.f32.mrb[5].mxu0 }
 0x14e   : > { %955 = vrot.lane.b32.xlu1 %v622_v19, %s1752_s26  ;;  %957 = vrot.lane.b32.xlu0 %v623_v10, %s1752_s26  ;;  %v619_v42 = vpop.f32.mrb[6].mxu0 }
 0x14f   : > { %1422 = vmatmul.mubr.msk.bf16.vlgmr.msra.gmra.mrb[4].mxu1 %vm625_vm2, %v622_v19  ;;  %v1418_v43 = vpop.f32.mrb[7].mxu0  ;;  %v690_v44 = vsel %vm688_vm4, %v624_v40, 0 }
 0x150   : > { %1433 = vmatprep.mubr.msk.bf16.mxu1 %vm1749_vm0, %v1748_v0  ;;  %1426 = vmatpush3.bf16.msra.mxu0 %v690_v44  ;;  %v1565_v44 = vld [vmem:[%s2147_s6] sm:$0xff]  }
 0x151   : > { %1437 = vmatprep.subr.bf16.mxu0 %v1748_v0 }
 0x1b8   : > { %v737_v25 = vpop.permute.xlu0 %736  ;;  %v848_v27 = vpop.permute.xlu1 %847 }
 0x1b9   : > { %v742_v26 = vsel %vm625_vm2, %v737_v25, 0  ;;  %v853_v29 = vsel %vm625_vm2, %v848_v27, 0 }
 0x1ba   : > { %1432 = vmatpush3.bf16.xpose.msra.mxu1 %v742_v26 }
 0x1bb   : > { %1443 = vmatprep.subr.bf16.mxu1 %v1748_v0 }
 0x1bc   : > { %v734_v28 = vpop.permute.xlu0 %733  ;;  %v846_v31 = vpop.permute.xlu1 %845 }
 0x1c0   : > { %v958_v30 = vpop.permute.xlu0 %957  ;;  %v956_v33 = vpop.permute.xlu1 %955 }
 0x1c1   : > { %1434 = vmatmul.mubr.msk.bf16.vlgmr.msra.gmra.mrb[8].mxu1 %vm625_vm2, %v734_v28  ;;  %v963_v32 = vsel %vm625_vm2, %v958_v30, 0 }
 0x1c2   : > { %1444 = vmatpush3.bf16.xpose.msra.mxu1 %v853_v29  ;;  %1445 = vmatprep.mubr.msk.bf16.mxu1 %vm1749_vm0, %v1748_v0 }
 0x1c3   : > { %1455 = vmatprep.subr.bf16.mxu1 %v1748_v0 }
 0x1c9   : > { %1446 = vmatmul.mubr.msk.bf16.vlgmr.msra.gmra.mrb[12].mxu1 %vm625_vm2, %v846_v31 }
 0x1ca   : > { %1456 = vmatpush3.bf16.xpose.msra.mxu1 %v963_v32  ;;  %1457 = vmatprep.mubr.msk.bf16.mxu1 %vm1749_vm0, %v1748_v0 }
 0x1cb   : > { %1467 = vmatprep.subr.bf16.mxu1 %v1748_v0 }
 0x1d1   : > { %1458 = vmatmul.mubr.msk.bf16.vlgmr.msra.gmra.mrb[16].mxu1 %vm625_vm2, %v956_v33 }
 0x1d2   : > { %1475 = vmatprep.mubr.msk.bf16.mxu1 %vm1749_vm0, %v1748_v0  ;;  %1468 = vmatpush3.bf16.msra.mxu1 %v1565_v44 }
 0x1d3   : > { %1469 = vmatprep.subr.bf16.mxu1 %v1748_v0 }
 0x222   : > { %v666_v34 = vpop.f32.mrb[4].mxu1 }
 0x223   : > { %v1423_v35 = vpop.f32.mrb[5].mxu1  ;;  %v673_v36 = vsel %vm672_vm3, %v666_v34, -inf }
 0x224   : > { %674 = vmax.xlane.f32.xlu0 %v673_v36  ;;  %v669_v37 = vpop.f32.mrb[6].mxu1 }
 0x225   : > { %v1424_v38 = vpop.f32.mrb[7].mxu1 }
 0x294   : > { %v778_v45 = vpop.f32.mrb[8].mxu1 }
 0x295   : > { %v1435_v46 = vpop.f32.mrb[9].mxu1  ;;  %v784_v47 = vsel %vm672_vm3, %v778_v45, -inf }
 0x296   : > { %785 = vmax.xlane.f32.xlu1 %v784_v47  ;;  %v781_v48 = vpop.f32.mrb[10].mxu1  ;;  %v1567_v46 = vld [vmem:[%s2147_s6 + $0x10] sm:$0xff]  }
 0x297   : > { %v1436_v49 = vpop.f32.mrb[11].mxu1 }
 0x29c   : > { %v889_v50 = vpop.f32.mrb[12].mxu1 }
 0x29d   : > { %v1447_v51 = vpop.f32.mrb[13].mxu1  ;;  %v895_v52 = vsel %vm672_vm3, %v889_v50, -inf }
 0x29e   : > { %896 = vmax.xlane.f32.xlu0 %v895_v52  ;;  %v892_v53 = vpop.f32.mrb[14].mxu1  ;;  %v1568_v51 = vld [vmem:[%s2147_s6 + $0x18] sm:$0xff]  }
 0x29f   : > { %v1448_v54 = vpop.f32.mrb[15].mxu1 }
 0x2a4   : > { %v999_v55 = vpop.f32.mrb[16].mxu1 }
 0x2a5   : > { %v1459_v56 = vpop.f32.mrb[17].mxu1  ;;  %v1005_v57 = vsel %vm672_vm3, %v999_v55, -inf }
 0x2a6   : > { %1006 = vmax.xlane.f32.xlu0 %v1005_v57  ;;  %v1002_v58 = vpop.f32.mrb[18].mxu1 }
 0x2a7   : > { %v1460_v59 = vpop.f32.mrb[19].mxu1 }
 0x2b1   : > { %v675_v60 = vpop.xlane.xlu0 %674 }
 0x2b2   : > { %v676_v61 = vsub.f32 %v666_v34, %v675_v60 }
 0x2b4   : > { %v677_v62 = vmul.f32 1.442695, %v676_v61 }
 0x2b6   : > { %1569 = vpow2.f32 %v677_v62 }
 0x2c0   : > { %v1570_v63 = vpop.eup %1569 }
 0x2c1   : > { %v679_v1 = vsel %vm672_vm3, %v1570_v63, 0.0 }
 0x2c2   : > { %680 = vadd.xlane.f32.xlu1 %v679_v1 }
 0x2d3   : > { %797 = vrot.lane.b32.xlu1 %v624_v40, %s1751_s21 }
 0x323   : > { %v786_v2 = vpop.xlane.xlu1 %785 }
 0x324   : > { %v787_v3 = vsub.f32 %v778_v45, %v786_v2  ;;  %v1566_v45 = vld [vmem:[%s2147_s6 + $0x8] sm:$0xff]  }
 0x325   : > { %1470 = vmatpush3.bf16.msra.mxu1 %v1566_v45 }
 0x326   : > { %v788_v4 = vmul.f32 1.442695, %v787_v3  ;;  %1471 = vmatprep.subr.bf16.mxu1 %v1748_v0  ;;  %v1353_v3 = vld [vmem:[%s2148_s7] ss:$0 sm:$0xff] }
 0x328   : > { %1571 = vpow2.f32 %v788_v4 }
 0x329   : > { %1472 = vmatpush3.bf16.msra.mxu1 %v1567_v46 }
 0x32a   : > { %1473 = vmatprep.subr.bf16.mxu1 %v1748_v0 }
 0x32b   : > { %v897_v5 = vpop.xlane.xlu0 %896 }
 0x32c   : > { %v898_v7 = vsub.f32 %v889_v50, %v897_v5 }
 0x32d   : > { %1474 = vmatpush3.bf16.msra.mxu1 %v1568_v51 }
 0x32e   : > { %v899_v8 = vmul.f32 1.442695, %v898_v7 }
 0x330   : > { %1573 = vpow2.f32 %v899_v8 }
 0x332   : > { %v1572_v9 = vpop.eup %1571 }
 0x333   : > { %v1007_v10 = vpop.xlane.xlu0 %1006  ;;  %v790_v11 = vsel %vm672_vm3, %v1572_v9, 0.0 }
 0x334   : > { %v1008_v12 = vsub.f32 %v999_v55, %v1007_v10  ;;  %791 = vadd.xlane.f32.xlu0 %v790_v11 }
 0x336   : > { %v1009_v13 = vmul.f32 1.442695, %v1008_v12 }
 0x338   : > { %1575 = vpow2.f32 %v1009_v13 }
 0x33a   : > { %v1574_v14 = vpop.eup %1573 }
 0x33b   : > { %v901_v15 = vsel %vm672_vm3, %v1574_v14, 0.0 }
 0x33c   : > { %902 = vadd.xlane.f32.xlu1 %v901_v15 }
 0x342   : > { %v1576_v16 = vpop.eup %1575 }
 0x343   : > { %v1011_v17 = vsel %vm672_vm3, %v1576_v16, 0.0 }
 0x344   : > { %1012 = vadd.xlane.f32.xlu0 %v1011_v17 }
 0x34d   : > { %1017 = vrot.lane.b32.xlu1 %v624_v40, %s1752_s26  ;;  %s418_s26 = sand.u32 1, %s1733_s14  }
 0x34e   : > { %s1332_s29 = sshll.u32 %s418_s26, 3  ;;  %s1195_s20 = scalar_lea.sflag [#allocation4], %s418_s26 }
 0x34f   : > { %v681_v18 = vpop.xlane.xlu1 %680  ;;  %s420_s15 = scalar_lea.vmem [#allocation8], %s1332_s29 }
 0x350   : > { %1577 = vrcp.f32 %v681_v18  ;;  %s1208_s25 = sshll.u32 %s420_s15, 4  ;;  %s2100_s25 = int_to_ptr.vmem [resolvable:$true] %s1208_s25 }
 0x353   : > { %v798_v20 = vpop.permute.xlu1 %797 }
 0x354   : > { %v803_v23 = vsel %vm688_vm4, %v798_v20, 0 }
 0x35a   : > { %v1578_v19 = vpop.eup %1577  ;;  %907 = vrot.lane.b32.xlu0 %v624_v40, %s1750_s24 }
 0x35b   : > { %v683_v21 = vmul.f32 %v1578_v19, %v1570_v63 }
 0x35d   : > { %v684_v22 = vpack.c.bf16 %v683_v21, %v683_v21 }
 0x35f   : > { %1428 = vmatmul.mubr.msk.bf16.vlgmr.msra.gmra.mrb[8].mxu0 %vm672_vm3, %v684_v22  ;;  %v1360_v22 = vld [vmem:[%s2150_s9] ss:$0 sm:$0xff] }
 0x360   : > { %1438 = vmatpush3.bf16.msra.mxu0 %v803_v23  ;;  %1439 = vmatprep.mubr.msk.bf16.mxu0 %vm1749_vm0, %v1748_v0 }
 0x361   : > { %1449 = vmatprep.subr.bf16.mxu0 %v1748_v0 }
 0x3c1   : > { %v792_v24 = vpop.xlane.xlu0 %791 }
 0x3c2   : > { %1579 = vrcp.f32 %v792_v24 }
 0x3c9   : > { %v903_v25 = vpop.xlane.xlu1 %902 }
 0x3ca   : > { %1581 = vrcp.f32 %v903_v25 }
 0x3cc   : > { %v1580_v26 = vpop.eup %1579 }
 0x3cd   : > { %v794_v27 = vmul.f32 %v1580_v26, %v1572_v9  ;;  %v1018_v34 = vpop.permute.xlu1 %1017 }
 0x3ce   : > { %v1023_v36 = vsel %vm688_vm4, %v1018_v34, 0 }
 0x3cf   : > { %v795_v28 = vpack.c.bf16 %v794_v27, %v794_v27 }
 0x3d1   : > { %v1013_v29 = vpop.xlane.xlu0 %1012  ;;  %1440 = vmatmul.mubr.msk.bf16.vlgmr.msra.gmra.mrb[12].mxu0 %vm672_vm3, %v795_v28 }
 0x3d2   : > { %1583 = vrcp.f32 %v1013_v29  ;;  %1451 = vmatprep.mubr.msk.bf16.mxu0 %vm1749_vm0, %v1748_v0 }
 0x3d4   : > { %v1582_v30 = vpop.eup %1581 }
 0x3d5   : > { %v905_v31 = vmul.f32 %v1582_v30, %v1574_v14  ;;  %v908_v32 = vpop.permute.xlu0 %907 }
 0x3d6   : > { %v913_v33 = vsel %vm688_vm4, %v908_v32, 0 }
 0x3d7   : > { %1450 = vmatpush3.bf16.msra.mxu0 %v913_v33  ;;  %v906_v35 = vpack.c.bf16 %v905_v31, %v905_v31 }
 0x3d8   : > { %1461 = vmatprep.subr.bf16.mxu0 %v1748_v0 }
 0x3da   : > { %1452 = vmatmul.mubr.msk.bf16.vlgmr.msra.gmra.mrb[16].mxu0 %vm672_vm3, %v906_v35 }
 0x3db   : > { %1462 = vmatpush3.bf16.msra.mxu0 %v1023_v36  ;;  %1463 = vmatprep.mubr.msk.bf16.mxu0 %vm1749_vm0, %v1748_v0 }
 0x3dc   : > { %v1584_v37 = vpop.eup %1583 }
 0x3dd   : > { %v1015_v38 = vmul.f32 %v1584_v37, %v1576_v16 }
 0x3df   : > { %v1016_v39 = vpack.c.bf16 %v1015_v38, %v1015_v38 }
 0x3e2   : > { %1464 = vmatmul.mubr.msk.bf16.vlgmr.msra.gmra.mrb[20].mxu0 %vm672_vm3, %v1016_v39 }
 0x432   : > { %v726_v40 = vpop.f32.mrb[8].mxu0 }
 0x433   : > { %v1429_v41 = vpop.f32.mrb[9].mxu0 }
 0x434   : > { %v729_v42 = vpop.f32.mrb[10].mxu0 }
 0x435   : > { %v1430_v43 = vpop.f32.mrb[11].mxu0 }
 0x4a4   : > { %v839_v47 = vpop.f32.mrb[12].mxu0 }
 0x4a5   : > { %1066 = vrot.lane.b32.xlu1 %v839_v47, %s1753_s12  ;;  %v1441_v48 = vpop.f32.mrb[13].mxu0 }
 0x4a6   : > { %v842_v49 = vpop.f32.mrb[14].mxu0 }
 0x4a7   : > { %v1442_v50 = vpop.f32.mrb[15].mxu0 }
 0x4ad   : > { %v949_v52 = vpop.f32.mrb[16].mxu0 }
 0x4ae   : > { %1070 = vrot.lane.b32.xlu0 %v949_v52, %s1754_s16  ;;  %v1453_v53 = vpop.f32.mrb[17].mxu0  ;;  %s1671_s16 = scalar_lea.vmem %s2100_s25, 128 }
 0x4af   : > { %v952_v54 = vpop.f32.mrb[18].mxu0  ;;  %p1672_p12 = scmp.ne.s32.totalorder %s2100_s25, %s1671_s16 }
 0x4b0   : > { %v1454_v55 = vpop.f32.mrb[19].mxu0 }
 0x4b1   : > { %p1673_p8 = pnand %p1672_p12, %p2177_p7 }
 0x4b3   : > { %p1674_p11 = pneg %p1673_p8 }
 0x4b5   : > { %v1059_v56 = vpop.f32.mrb[20].mxu0 }
 0x4b6   : > { %1074 = vrot.lane.b32.xlu1 %v1059_v56, %s1755_s19  ;;  %v1465_v57 = vpop.f32.mrb[21].mxu0  ;;  %s1675_s19 = sshll.u32 %s1756_s17, 4  ;;  %s1676_s19 = int_to_ptr.vmem [resolvable:$false] %s1675_s19 }
 0x4b7   : > { %v1062_v58 = vpop.f32.mrb[22].mxu0  ;;  %s1677_s24 = scalar_lea.vmem %s1676_s19, 256  ;;  %p1678_p13 = scmp.lt.s32.totalorder %s2100_s25, %s1676_s19 }
 0x4b8   : > { %v1466_v59 = vpop.f32.mrb[23].mxu0  ;;  %p1679_p1 = scmp.lt.s32.totalorder %s1677_s24, %s1671_s16 }
 0x4ba   : > { %p1680_p6 = por %p1679_p1, %p1678_p13 }
 0x4bc   : > { %p1681_p9 = pnand %p1680_p6, %p1674_p11 }
 0x517   : > { %v1067_v60 = vpop.permute.xlu1 %1066 }
 0x518   : > { %v1077_v0 = vsel %vm625_vm2, %v726_v40, %v1067_v60 }
 0x520   : > { %v1071_v61 = vpop.permute.xlu0 %1070 }
 0x521   : > { %v1078_v62 = vsel %vm459_vm1, %v1077_v0, %v1071_v61 }
 0x528   : > { %v1075_v63 = vpop.permute.xlu1 %1074 }
 0x529   : > { %v1080_v1 = vsel %vm1079_vm5, %v1078_v62, %v1075_v63 }
 0x52a   : > { %v1081_v2 = vpack.c.bf16 %v1080_v1, %v1080_v1 }
 0x52c   : > { %1476 = vmatmul.mubr.msk.bf16.vlgmr.msra.gmra.mrb[20].mxu1 %vm1120_vm6, %v1081_v2 }
 0x5ff   : > { %v1158_v4 = vpop.f32.mrb[20].mxu1 }
 0x600   : > { %v1159_v5 = vadd.f32 %v1353_v3, %v1158_v4  ;;  %v1477_v7 = vpop.f32.mrb[21].mxu1 }
 0x601   : > { %v1161_v8 = vpop.f32.mrb[22].mxu1 }
 0x602   : > { %v1478_v9 = vpop.f32.mrb[23].mxu1  ;;  %v1164_v10 = vadd.f32 %v1159_v5, %v1989_v6  ;;  %v1359_v6 = vld [vmem:[%s2149_s8] ss:$0 sm:$0xff] }
 0x604   : > { %v1165_v11 = vsel %vm459_vm1, %v1164_v10, 0.0 }
 0x605   : > { %1166 = vadd.xlane.f32.xlu0 %v1165_v11 }
 0x692   : > { %v1167_v12 = vpop.xlane.xlu0 %1166 }
 0x693   : > { %v1169_v13 = vmul.f32 0.03125, %v1167_v12 }
 0x695   : > { %v1170_v14 = vsub.f32 %v1164_v10, %v1169_v13 }
 0x697   : > { %v1171_v15 = vmul.f32 %v1170_v14, %v1170_v14 }
 0x699   : > { %v1172_v16 = vsel %vm459_vm1, %v1171_v15, 0.0 }
 0x69a   : > { %1173 = vadd.xlane.f32.xlu1 %v1172_v16 }
 0x727   : > { %v1174_v17 = vpop.xlane.xlu1 %1173 }
 0x728   : > { %v1175_v18 = vmul.f32 0.03125, %v1174_v17 }
 0x72a   : > { %v1176_v19 = vadd.f32 1e-12, %v1175_v18 }
 0x72c   : > { %1585 = vrsqrt.f32 %v1176_v19 }
 0x736   : > { %v1586_v20 = vpop.eup %1585 }
 0x737   : > { %v1178_v21 = vmul.f32 %v1586_v20, %v1170_v14 }
 0x739   : > { %v1185_v23 = vmul.f32 %v1359_v6, %v1178_v21 }
 0x73b   : > { %v1192_v24 = vadd.f32 %v1360_v22, %v1185_v23 }
 0x73d   : > { %1193 = vst.msk [vmem:[%s420_s15] sm:$0xff] %vm459_vm1, %v1192_v24 }
 0x73e   : > { %1684 = shalt.err (!%p1681_p9)
}
 0x73f   : > { %s1685_s21 = scalar_lea.hbm %s2098_s18, 128  ;;  %s1689_s11 = scalar_lea.hbm %s2151_s10, 256 }
 0x740   : > { %p1686_p2 = scmp.ne.s32.totalorder %s2098_s18, %s1685_s21  ;;  %p1690_p5 = scmp.lt.u32.totalorder %s2098_s18, %s2151_s10 }
 0x741   : > { %p1691_p10 = scmp.lt.u32.totalorder %s1689_s11, %s1685_s21  ;;  %p1693_p12 = scmp.lt.u32.totalorder %s1685_s21, %s2098_s18 }
 0x742   : > { %p1687_p0 = pnand %p1686_p2, %p2177_p7 }
 0x743   : > { %p1692_p4 = por %p1691_p10, %p1690_p5 }
 0x744   : > { %p1688_p3 = pneg %p1687_p0 }
 0x745   : > { %p1694_p8 = por %p1693_p12, %p1692_p4 }
 0x747   : > { %p1695_p11 = pnand %p1694_p8, %p1688_p3 }
 0x749   : > { %1698 = shalt.err (!%p1695_p11)
}
 0x74a   : > { %1491 = dma.vmem_to_hbm [thread:$0]  (%p2177_p7), %s2100_s25, 128, %s2098_s18, %s1195_s20  }
 0x74b PF: > { %s2178_s30 = sld [smem:[#allocation14_spill]]  ;;  %s2179_s13 = sld [smem:[#allocation12_spill]] }
 0x74c   : > { %s2180_s15 = sld [smem:[#allocation17_spill]] }
 0x751   : > { %p1513_p13 = scmp.ge.s32.totalorder %s2178_s30, 2  ;;  %s1220_s28 = sand.u32 1, %s2179_s13  }
 0x752   : > { %p2181_p1 = scmp.ne.s32.totalorder %s2180_s15, 0  ;;  %s1221_s12 = scalar_lea.sflag [#allocation4], %s1220_s28 }
 0x754   : > { %p1504_p6 = pnand %p1513_p13, %p2181_p1 }
 0x756   : > { %1724 = dma.done.wait (!%p1504_p6), %s1221_s12, 128  }
 0x757   : > { %1726 = vsyncadd (!%p1504_p6), %s1221_s12, 4294967168  ;;  %s2182_s16 = sld [smem:[#allocation15_spill]]  ;;  %s2183_s17 = sld [smem:[#allocation13_spill]] }
 0x758   : > { %s2184_s15 = sld [smem:[#allocation16_spill]]  ;;  %s2185_s13 = smov %s1733_s14 }
 0x75d   : > { %p22_p9 = scmp.ge.s32.totalorder %s2182_s16, 4   ;;  %s2186_s14 = smov %s2183_s17 }
 0x75f   :  { %24 = sbr.rel (!%p22_p9) target bundleno = 5 (0x5), region = 114 }
 0x766   :  { %1226 = vsyncpa [#allocation3], 1 }
 0x767   :  { %1228 = vsyncpa [#allocation3 + $0x1], 1 }
 0x768   :  { %1229 = vsyncpa [#allocation6], 1 }
 0x769   :  { %1230 = vsyncpa [#allocation4], 1 }
 0x76a   :  { %1232 = vsyncpa [#allocation4 + $0x1], 1 }

</bundles_post_ra>
